<compile_context>
chip_gen: v7x
topology: tpu7x:2x2x1
jax: 0.10.0
libtpu: 0.0.40
codegen_flags: <defaults>
</compile_context>

<pallas_src>
import functools

import numpy as np
import jax
import jax.numpy as jnp
from jax import lax
from jax.experimental import pallas as pl
from jax.experimental.pallas import tpu as pltpu


def _round_up(x, m):
    return ((x + m - 1) // m) * m


def _caltloss_kernel(feats_ref, loss_ref, correct_ref, csum_ref, *,
                     chunk, n, label_num, n_rows, tb, guard_tail,
                     inv_chunk, inv_n):
    """flag=0 forward of CenterAlignedTripletLoss3.

    feats_ref : (tb, D) fp32 block of the (B, D) feature matrix (grid axis 0)
    csum_ref  : (N_PAD, D) fp32 resident accumulator of per-center sums
    loss_ref / correct_ref : (1, 1) SMEM scalars
    """
    kb = pl.program_id(0)
    n_pad = csum_ref.shape[0]

    @pl.when(kb == 0)
    def _init():
        csum_ref[...] = jnp.zeros_like(csum_ref)

    # ---- per-block segment sum on the MXU --------------------------------
    x = feats_ref[...]                                        # (tb, D) fp32
    row0 = kb * tb
    if guard_tail:
        # Last block extends past B: zero the garbage rows.  jnp.where (a
        # select) kills any NaN/Inf bit patterns, unlike multiplying by 0.
        in_rng = (lax.broadcasted_iota(jnp.int32, (tb, 1), 0) + row0) < n_rows
        x = jnp.where(in_rng, x, 0.0)

    cid = lax.broadcasted_iota(jnp.int32, (n_pad, tb), 0)          # center id
    g = lax.broadcasted_iota(jnp.int32, (n_pad, tb), 1) + row0     # global row
    lo = cid * chunk
    sel = (g >= lo) & (g < lo + chunk)                     # one-hot segments
    csum_ref[...] += jnp.dot(sel.astype(jnp.float32), x,
                             preferred_element_type=jnp.float32)

    # ---- N x N triplet stage (runs once, on the last grid step) ----------
    @pl.when(kb == pl.num_programs(0) - 1)
    def _finalize():
        centers = csum_ref[...] * inv_chunk                    # (N_PAD, D)
        t = centers * centers
        sq_col = jnp.sum(t, axis=1, keepdims=True)             # ||c_i||^2

        dims = (((1,), (1,)), ((), ()))
        # gram[i, j] = <c_i, c_j>
        gram = lax.dot_general(centers, centers, dims,
                               preferred_element_type=jnp.float32)
        # sq_row[i, j] = ||c_j||^2  (row broadcast on the MXU; no transpose)
        sq_row = lax.dot_general(jnp.ones_like(centers), t, dims,
                                 preferred_element_type=jnp.float32)

        dist2 = sq_col + sq_row - 2.0 * gram
        dist = jnp.sqrt(jnp.maximum(dist2, 1e-12))

        # pair masks generated in-kernel: targets = cat([uniq, uniq, uniq]),
        # so targets[i] == targets[j]  <=>  |i - j| in {0, L, 2L}.
        ii = lax.broadcasted_iota(jnp.int32, (n_pad, n_pad), 0)
        jj = lax.broadcasted_iota(jnp.int32, (n_pad, n_pad), 1)
        d_ij = jnp.abs(ii - jj)
        same = (d_ij == 0) | (d_ij == label_num) | (d_ij == 2 * label_num)
        valid = (ii < n) & (jj < n)
        is_pos = jnp.where(same & valid, 1.0, 0.0)
        is_neg = jnp.where((~same) & valid, 1.0, 0.0)
        row_valid = (lax.broadcasted_iota(jnp.int32, (n_pad, 1), 0) < n
                     ).astype(jnp.float32)

        dist_ap = dist * is_pos
        dist_an = dist * is_neg

        # softmax_weights(dist_ap, is_pos) folded into a weighted row sum:
        #   fp = sum(dist_ap * exp(dist_ap - max) * is_pos) / (sum(exp*is_pos)+1e-6)
        max_ap = jnp.max(dist_ap, axis=1, keepdims=True)
        e_ap = jnp.exp(dist_ap - max_ap) * is_pos
        num_ap = jnp.sum(dist_ap * e_ap, axis=1, keepdims=True)
        den_ap = jnp.sum(e_ap, axis=1, keepdims=True) + 1e-6
        furthest_positive = num_ap * pl.reciprocal(den_ap)

        # softmax_weights(-dist_an, is_neg)
        max_an = jnp.max(-dist_an, axis=1, keepdims=True)
        e_an = jnp.exp(-dist_an - max_an) * is_neg
        num_an = jnp.sum(dist_an * e_an, axis=1, keepdims=True)
        den_an = jnp.sum(e_an, axis=1, keepdims=True) + 1e-6
        closest_negative = num_an * pl.reciprocal(den_an)

        # nn.SoftMarginLoss(x, y=1) = mean(softplus(-x)),  x = cn - fp
        # stable softplus(z) = max(z, 0) + log1p(exp(-|z|)),  z = fp - cn
        z = furthest_positive - closest_negative
        per_row = jnp.maximum(z, 0.0) + jnp.log1p(jnp.exp(-jnp.abs(z)))
        loss_ref[0, 0] = jnp.sum(per_row * row_valid) * inv_n

        correct_f = jnp.sum(
            jnp.where(closest_negative >= furthest_positive, 1.0, 0.0)
            * row_valid)
        correct_ref[0, 0] = correct_f.astype(jnp.int32)


def center_aligned_triplet_loss3(feats, labels, label_num, margin=0.3, flag=0,
                                 block_rows=None):
    """flag=0 path of CenterAlignedTripletLoss3.forward. Returns (loss, correct).

    Assumes `labels` contains exactly `label_num` distinct values (the PyTorch
    module derives label_num = len(labels.unique())).  The pair structure of
    targets = cat([uniq]*3) then depends only on indices, so the labels array
    itself is not needed on device.
    """
    # TODO(synk): flag=1 branch (dist[i][mask[i]].max()/min() boolean-mask
    # indexing + MarginRankingLoss) is not implemented in the Pallas kernel.
    assert flag == 0
    del labels, margin  # unused in the flag=0 path (see docstring)

    B, D = feats.shape
    n = label_num * 3
    chunk = B // n
    assert chunk * n == B, "batch must split evenly into label_num*3 chunks"

    n_pad = max(8, _round_up(n, 8))

    # Row-block size: ~2 MiB of fp32 rows per block, multiple of 8 rows.
    if block_rows is None:
        tb = max(8, min(1024, ((2 * 1024 * 1024) // (D * 4)) // 8 * 8))
    else:
        tb = block_rows
    if tb >= B:
        tb = B                       # single full-extent block (always legal)
    else:
        assert tb % 8 == 0
    grid_b = pl.cdiv(B, tb)
    guard_tail = (B % tb) != 0

    feats_f = feats.astype(jnp.float32)

    kernel = functools.partial(
        _caltloss_kernel, chunk=chunk, n=n, label_num=label_num, n_rows=B,
        tb=tb, guard_tail=guard_tail,
        inv_chunk=1.0 / float(chunk), inv_n=1.0 / float(n))

    cost = pl.CostEstimate(
        flops=int(2 * n_pad * B * D             # segment-sum matmuls
                  + 4 * n_pad * n_pad * D       # gram + row-broadcast matmuls
                  + 32 * n_pad * n_pad),        # N^2 elementwise stage
        transcendentals=int(2 * n_pad * n_pad + 8 * n_pad),
        bytes_accessed=int(B * D * 4 + 8))

    est_vmem = (2 * tb * _round_up(D, 128) * 4          # double-buffered blocks
                + n_pad * _round_up(D, 128) * 4         # center-sum scratch
                + 16 * n_pad * n_pad * 4) + (1 << 20)   # N^2 temporaries
    vmem_limit = int(min(max(est_vmem, 32 * 1024 * 1024), 56 * 1024 * 1024))

    loss, correct = pl.pallas_call(
        kernel,
        out_shape=(jax.ShapeDtypeStruct((1, 1), jnp.float32),
                   jax.ShapeDtypeStruct((1, 1), jnp.int32)),
        grid_spec=pltpu.PrefetchScalarGridSpec(
            num_scalar_prefetch=0,
            grid=(grid_b,),
            in_specs=[pl.BlockSpec((tb, D), lambda k: (k, 0))],
            out_specs=(
                pl.BlockSpec(memory_space=pltpu.MemorySpace.SMEM),
                pl.BlockSpec(memory_space=pltpu.MemorySpace.SMEM),
            ),
            scratch_shapes=[pltpu.VMEM((n_pad, D), jnp.float32)],
        ),
        compiler_params=pltpu.CompilerParams(
            dimension_semantics=("arbitrary",),
            vmem_limit_bytes=vmem_limit),
        cost_estimate=cost,
    )(feats_f)
    return loss[0, 0], correct[0, 0]


def _reference(feats, labels, label_num):
    """Pure-JAX reference replicating the PyTorch flag=0 forward."""
    n = label_num * 3
    chunk = feats.shape[0] // n
    label_uni = jnp.unique(labels, size=label_num)
    targets = jnp.concatenate([label_uni, label_uni, label_uni])
    centers = feats.astype(jnp.float32).reshape(n, chunk, -1).mean(axis=1)
    sq = jnp.sum(centers ** 2, axis=1, keepdims=True)
    dist = sq + sq.T - 2.0 * centers @ centers.T
    dist = jnp.sqrt(jnp.clip(dist, 1e-12))
    is_pos = (targets[:, None] == targets[None, :]).astype(jnp.float32)
    is_neg = 1.0 - is_pos

    def smw(d, m):
        mv = jnp.max(d * m, axis=1, keepdims=True)
        e = jnp.exp(d - mv) * m
        return e / (jnp.sum(e, axis=1, keepdims=True) + 1e-6)

    dist_ap = dist * is_pos
    dist_an = dist * is_neg
    fp = jnp.sum(dist_ap * smw(dist_ap, is_pos), axis=1)
    cn = jnp.sum(dist_an * smw(-dist_an, is_neg), axis=1)
    loss = jnp.mean(jnp.log1p(jnp.exp(-(cn - fp))))
    correct = jnp.sum(cn >= fp)
    return loss, correct


if __name__ == "__main__":
    key = jax.random.PRNGKey(0)
    k1, k2 = jax.random.split(key)

    # --- test 1: tiny shapes, single-block path ---------------------------
    label_num = 2                      # 2 unique identities
    chunk = 4                          # samples per chunk
    D = 32                             # feature dim
    n = label_num * 3                  # 6 centers
    B = n * chunk                      # batch = 24

    feats = jax.random.normal(k1, (B, D), dtype=jnp.float32)
    labels = jnp.array([0] * (B // 2) + [1] * (B // 2), dtype=jnp.int32)

    loss, correct = center_aligned_triplet_loss3(feats, labels, label_num)
    jax.block_until_ready(loss)
    jax.block_until_ready(correct)

    loss_ref, correct_ref = _reference(feats, labels, label_num)
    np.testing.assert_allclose(np.asarray(loss), np.asarray(loss_ref),
                               rtol=1e-4, atol=1e-5)
    assert int(correct) == int(correct_ref), (int(correct), int(correct_ref))

    # --- test 2: multi-block grid + tail guard + unaligned feature dim ----
    label_num2 = 3
    chunk2 = 40
    D2 = 100
    n2 = label_num2 * 3
    B2 = n2 * chunk2                   # 360 rows, D=100 (not lane-aligned)

    feats2 = jax.random.normal(k2, (B2, D2), dtype=jnp.float32)
    labels2 = (jnp.arange(B2, dtype=jnp.int32) % label_num2)

    loss2, correct2 = center_aligned_triplet_loss3(
        feats2, labels2, label_num2, block_rows=64)   # 6 blocks, ragged tail
    jax.block_until_ready(loss2)
    jax.block_until_ready(correct2)

    loss2_ref, correct2_ref = _reference(feats2, labels2, label_num2)
    np.testing.assert_allclose(np.asarray(loss2), np.asarray(loss2_ref),
                               rtol=1e-4, atol=1e-4)
    assert int(correct2) == int(correct2_ref), (int(correct2), int(correct2_ref))

    print("KERNEL_OK")
</pallas_src>

<mosaic_0001>
module attributes {stable_mosaic.version = 11 : i64} {
  func.func @_caltloss_kernel(%arg0: i32, %arg1: memref<24x32xf32, #tpu.memory_space<vmem>>, %arg2: memref<1x1xf32, #tpu.memory_space<smem>>, %arg3: memref<1x1xi32, #tpu.memory_space<smem>>, %arg4: memref<8x32xf32, #tpu.memory_space<vmem>>) attributes {dimension_semantics = [#tpu.dimension_semantics<arbitrary>], iteration_bounds = array<i64: 1>, scalar_prefetch = 0 : i64, scratch_operands = 1 : i64, tpu.core_type = #tpu.core_type<tc>, window_params = [{transform_indices = @transform_0, window_bounds = array<i64: 24, 32>}, {transform_indices = @transform_1, window_bounds = array<i64: 1, 1>}, {transform_indices = @transform_2, window_bounds = array<i64: 1, 1>}]} {
    %c0_i32 = arith.constant 0 : i32
    %0 = arith.cmpi eq, %arg0, %c0_i32 : i32
    %1 = arith.extui %0 : i1 to i32
    %c0_i32_0 = arith.constant 0 : i32
    %2 = arith.cmpi ne, %1, %c0_i32_0 : i32
    scf.if %2 {
      %cst_9 = arith.constant 0.000000e+00 : f32
      %25 = vector.broadcast %cst_9 : f32 to vector<8x32xf32>
      %c0_10 = arith.constant 0 : index
      %c0_11 = arith.constant 0 : index
      %26 = vector.load %arg4[%c0_10, %c0_11] : memref<8x32xf32, #tpu.memory_space<vmem>>, vector<8x32xf32>
      tpu.vector_store %arg4[%c0_10, %c0_11], %25 {strides = array<i32>} : memref<8x32xf32, #tpu.memory_space<vmem>>, vector<8x32xf32>,
    } else {
    }
    %c0 = arith.constant 0 : index
    %c0_1 = arith.constant 0 : index
    %3 = vector.load %arg1[%c0, %c0_1] : memref<24x32xf32, #tpu.memory_space<vmem>>, vector<24x32xf32>
    %c24_i32 = arith.constant 24 : i32
    %4 = arith.muli %arg0, %c24_i32 : i32
    %5 = tpu.iota {dimensions = array<i32: 0>} : vector<8x24xi32>
    %6 = tpu.iota {dimensions = array<i32: 1>} : vector<8x24xi32>
    %7 = vector.broadcast %4 : i32 to vector<8x24xi32>
    %8 = arith.addi %6, %7 : vector<8x24xi32>
    %c4_i32 = arith.constant 4 : i32
    %9 = vector.broadcast %c4_i32 : i32 to vector<8x24xi32>
    %10 = arith.muli %5, %9 : vector<8x24xi32>
    %11 = arith.cmpi sge, %8, %10 : vector<8x24xi32>
    %c4_i32_2 = arith.constant 4 : i32
    %12 = vector.broadcast %c4_i32_2 : i32 to vector<8x24xi32>
    %13 = arith.addi %10, %12 : vector<8x24xi32>
    %14 = arith.cmpi slt, %8, %13 : vector<8x24xi32>
    %15 = arith.andi %11, %14 : vector<8x24xi1>
    %c0_3 = arith.constant 0 : index
    %c0_4 = arith.constant 0 : index
    %16 = vector.load %arg4[%c0_3, %c0_4] : memref<8x32xf32, #tpu.memory_space<vmem>>, vector<8x32xf32>
    %17 = arith.extui %15 : vector<8x24xi1> to vector<8x24xi32>
    %18 = arith.sitofp %17 : vector<8x24xi32> to vector<8x24xf32>
    %cst = arith.constant dense<0.000000e+00> : vector<8x32xf32>
    %19 = tpu.matmul %18, %3, %cst {dimension_numbers = #tpu.dot_dimension_numbers<[1], [0], [0], [1], [0, 0, 1, 1], [], []>} : vector<8x24xf32>, vector<24x32xf32>, vector<8x32xf32> -> vector<8x32xf32>
    %20 = arith.addf %16, %19 : vector<8x32xf32>
    %c0_5 = arith.constant 0 : index
    %c0_6 = arith.constant 0 : index
    %21 = vector.load %arg4[%c0_5, %c0_6] : memref<8x32xf32, #tpu.memory_space<vmem>>, vector<8x32xf32>
    tpu.vector_store %arg4[%c0_5, %c0_6], %20 {strides = array<i32>} : memref<8x32xf32, #tpu.memory_space<vmem>>, vector<8x32xf32>,
    %c0_i32_7 = arith.constant 0 : i32
    %22 = arith.cmpi eq, %arg0, %c0_i32_7 : i32
    %23 = arith.extui %22 : i1 to i32
    %c0_i32_8 = arith.constant 0 : i32
    %24 = arith.cmpi ne, %23, %c0_i32_8 : i32
    scf.if %24 {
      %c0_9 = arith.constant 0 : index
      %c0_10 = arith.constant 0 : index
      %25 = vector.load %arg4[%c0_9, %c0_10] : memref<8x32xf32, #tpu.memory_space<vmem>>, vector<8x32xf32>
      %cst_11 = arith.constant 2.500000e-01 : f32
      %26 = vector.broadcast %cst_11 : f32 to vector<8x32xf32>
      %27 = arith.mulf %25, %26 : vector<8x32xf32>
      %28 = arith.mulf %27, %27 : vector<8x32xf32>
      %cst_12 = arith.constant dense<0.000000e+00> : vector<8xf32>
      %29 = vector.multi_reduction <add>, %28, %cst_12 [1] : vector<8x32xf32> to vector<8xf32>
      %30 = vector.shape_cast %29 : vector<8xf32> to vector<8x1xf32>
      %cst_13 = arith.constant dense<0.000000e+00> : vector<8x8xf32>
      %31 = tpu.matmul %27, %27, %cst_13 {dimension_numbers = #tpu.dot_dimension_numbers<[1], [1], [0], [0], [0, 0, 1, 0], [], []>} : vector<8x32xf32>, vector<8x32xf32>, vector<8x8xf32> -> vector<8x8xf32>
      %cst_14 = arith.constant 1.000000e+00 : f32
      %32 = vector.broadcast %cst_14 : f32 to vector<8x32xf32>
      %cst_15 = arith.constant dense<0.000000e+00> : vector<8x8xf32>
      %33 = tpu.matmul %32, %28, %cst_15 {dimension_numbers = #tpu.dot_dimension_numbers<[1], [1], [0], [0], [0, 0, 1, 0], [], []>} : vector<8x32xf32>, vector<8x32xf32>, vector<8x8xf32> -> vector<8x8xf32>
      %34 = vector.broadcast %30 : vector<8x1xf32> to vector<8x8xf32>
      %35 = arith.addf %34, %33 : vector<8x8xf32>
      %cst_16 = arith.constant 2.000000e+00 : f32
      %36 = vector.broadcast %cst_16 : f32 to vector<8x8xf32>
      %37 = arith.mulf %36, %31 : vector<8x8xf32>
      %38 = arith.subf %35, %37 : vector<8x8xf32>
      %cst_17 = arith.constant 9.99999996E-13 : f32
      %39 = vector.broadcast %cst_17 : f32 to vector<8x8xf32>
      %40 = arith.maximumf %38, %39 : vector<8x8xf32>
      %41 = math.sqrt %40 : vector<8x8xf32>
      %42 = tpu.iota {dimensions = array<i32: 0>} : vector<8x8xi32>
      %43 = tpu.iota {dimensions = array<i32: 1>} : vector<8x8xi32>
      %44 = arith.subi %42, %43 : vector<8x8xi32>
      %45 = math.absi %44 : vector<8x8xi32>
      %c0_i32_18 = arith.constant 0 : i32
      %46 = vector.broadcast %c0_i32_18 : i32 to vector<8x8xi32>
      %47 = arith.cmpi eq, %45, %46 : vector<8x8xi32>
      %c2_i32 = arith.constant 2 : i32
      %48 = vector.broadcast %c2_i32 : i32 to vector<8x8xi32>
      %49 = arith.cmpi eq, %45, %48 : vector<8x8xi32>
      %50 = arith.ori %47, %49 : vector<8x8xi1>
      %c4_i32_19 = arith.constant 4 : i32
      %51 = vector.broadcast %c4_i32_19 : i32 to vector<8x8xi32>
      %52 = arith.cmpi eq, %45, %51 : vector<8x8xi32>
      %53 = arith.ori %50, %52 : vector<8x8xi1>
      %c6_i32 = arith.constant 6 : i32
      %54 = vector.broadcast %c6_i32 : i32 to vector<8x8xi32>
      %55 = arith.cmpi slt, %42, %54 : vector<8x8xi32>
      %c6_i32_20 = arith.constant 6 : i32
      %56 = vector.broadcast %c6_i32_20 : i32 to vector<8x8xi32>
      %57 = arith.cmpi slt, %43, %56 : vector<8x8xi32>
      %58 = arith.andi %55, %57 : vector<8x8xi1>
      %59 = arith.andi %53, %58 : vector<8x8xi1>
      %cst_21 = arith.constant 1.000000e+00 : f32
      %cst_22 = arith.constant 0.000000e+00 : f32
      %60 = vector.broadcast %cst_21 : f32 to vector<8x8xf32>
      %61 = vector.broadcast %cst_22 : f32 to vector<8x8xf32>
      %62 = arith.select %59, %60, %61 : vector<8x8xi1>, vector<8x8xf32>
      %cst_23 = arith.constant dense<true> : vector<8x8xi1>
      %63 = arith.xori %53, %cst_23 : vector<8x8xi1>
      %64 = arith.andi %63, %58 : vector<8x8xi1>
      %cst_24 = arith.constant 1.000000e+00 : f32
      %cst_25 = arith.constant 0.000000e+00 : f32
      %65 = vector.broadcast %cst_24 : f32 to vector<8x8xf32>
      %66 = vector.broadcast %cst_25 : f32 to vector<8x8xf32>
      %67 = arith.select %64, %65, %66 : vector<8x8xi1>, vector<8x8xf32>
      %68 = tpu.iota {dimensions = array<i32: 0>} : vector<8x1xi32>
      %c6_i32_26 = arith.constant 6 : i32
      %69 = vector.broadcast %c6_i32_26 : i32 to vector<8x1xi32>
      %70 = arith.cmpi slt, %68, %69 : vector<8x1xi32>
      %71 = arith.extui %70 : vector<8x1xi1> to vector<8x1xi32>
      %72 = arith.sitofp %71 : vector<8x1xi32> to vector<8x1xf32>
      %73 = arith.mulf %41, %62 : vector<8x8xf32>
      %74 = arith.mulf %41, %67 : vector<8x8xf32>
      %cst_27 = arith.constant dense<0xFF800000> : vector<8xf32>
      %75 = vector.multi_reduction <maximumf>, %73, %cst_27 [1] : vector<8x8xf32> to vector<8xf32>
      %76 = vector.shape_cast %75 : vector<8xf32> to vector<8x1xf32>
      %77 = vector.broadcast %76 : vector<8x1xf32> to vector<8x8xf32>
      %78 = arith.subf %73, %77 : vector<8x8xf32>
      %79 = math.exp %78 : vector<8x8xf32>
      %80 = arith.mulf %79, %62 : vector<8x8xf32>
      %81 = arith.mulf %73, %80 : vector<8x8xf32>
      %cst_28 = arith.constant dense<0.000000e+00> : vector<8xf32>
      %82 = vector.multi_reduction <add>, %81, %cst_28 [1] : vector<8x8xf32> to vector<8xf32>
      %83 = vector.shape_cast %82 : vector<8xf32> to vector<8x1xf32>
      %cst_29 = arith.constant dense<0.000000e+00> : vector<8xf32>
      %84 = vector.multi_reduction <add>, %80, %cst_29 [1] : vector<8x8xf32> to vector<8xf32>
      %85 = vector.shape_cast %84 : vector<8xf32> to vector<8x1xf32>
      %cst_30 = arith.constant 9.99999997E-7 : f32
      %86 = vector.broadcast %cst_30 : f32 to vector<8x1xf32>
      %87 = arith.addf %85, %86 : vector<8x1xf32>
      %88 = tpu.reciprocal %87 : vector<8x1xf32> -> vector<8x1xf32>
      %89 = arith.mulf %83, %88 : vector<8x1xf32>
      %cst_31 = arith.constant 0.000000e+00 : f32
      %90 = vector.broadcast %cst_31 : f32 to vector<8x8xf32>
      %91 = arith.subf %90, %74 : vector<8x8xf32>
      %cst_32 = arith.constant dense<0xFF800000> : vector<8xf32>
      %92 = vector.multi_reduction <maximumf>, %91, %cst_32 [1] : vector<8x8xf32> to vector<8xf32>
      %93 = vector.shape_cast %92 : vector<8xf32> to vector<8x1xf32>
      %cst_33 = arith.constant 0.000000e+00 : f32
      %94 = vector.broadcast %cst_33 : f32 to vector<8x8xf32>
      %95 = arith.subf %94, %74 : vector<8x8xf32>
      %96 = vector.broadcast %93 : vector<8x1xf32> to vector<8x8xf32>
      %97 = arith.subf %95, %96 : vector<8x8xf32>
      %98 = math.exp %97 : vector<8x8xf32>
      %99 = arith.mulf %98, %67 : vector<8x8xf32>
      %100 = arith.mulf %74, %99 : vector<8x8xf32>
      %cst_34 = arith.constant dense<0.000000e+00> : vector<8xf32>
      %101 = vector.multi_reduction <add>, %100, %cst_34 [1] : vector<8x8xf32> to vector<8xf32>
      %102 = vector.shape_cast %101 : vector<8xf32> to vector<8x1xf32>
      %cst_35 = arith.constant dense<0.000000e+00> : vector<8xf32>
      %103 = vector.multi_reduction <add>, %99, %cst_35 [1] : vector<8x8xf32> to vector<8xf32>
      %104 = vector.shape_cast %103 : vector<8xf32> to vector<8x1xf32>
      %cst_36 = arith.constant 9.99999997E-7 : f32
      %105 = vector.broadcast %cst_36 : f32 to vector<8x1xf32>
      %106 = arith.addf %104, %105 : vector<8x1xf32>
      %107 = tpu.reciprocal %106 : vector<8x1xf32> -> vector<8x1xf32>
      %108 = arith.mulf %102, %107 : vector<8x1xf32>
      %109 = arith.subf %89, %108 : vector<8x1xf32>
      %cst_37 = arith.constant 0.000000e+00 : f32
      %110 = vector.broadcast %cst_37 : f32 to vector<8x1xf32>
      %111 = arith.maximumf %109, %110 : vector<8x1xf32>
      %112 = math.absf %109 : vector<8x1xf32>
      %cst_38 = arith.constant 0.000000e+00 : f32
      %113 = vector.broadcast %cst_38 : f32 to vector<8x1xf32>
      %114 = arith.subf %113, %112 : vector<8x1xf32>
      %115 = math.exp %114 : vector<8x1xf32>
      %116 = math.log1p %115 : vector<8x1xf32>
      %117 = arith.addf %111, %116 : vector<8x1xf32>
      %118 = arith.mulf %117, %72 : vector<8x1xf32>
      %119 = vector.shape_cast %118 : vector<8x1xf32> to vector<1x8x1xf32>
      %cst_39 = arith.constant dense<0.000000e+00> : vector<1xf32>
      %120 = vector.multi_reduction <add>, %119, %cst_39 [1, 2] : vector<1x8x1xf32> to vector<1xf32>
      %121 = vector.shape_cast %120 : vector<1xf32> to vector<1x1x1xf32>
      %122 = vector.extract %121[0, 0, 0] : f32 from vector<1x1x1xf32>
      %cst_40 = arith.constant 0.166666672 : f32
      %123 = arith.mulf %122, %cst_40 : f32
      %c0_41 = arith.constant 0 : index
      %c0_42 = arith.constant 0 : index
      %124 = memref.load %arg2[%c0_41, %c0_42] : memref<1x1xf32, #tpu.memory_space<smem>>
      memref.store %123, %arg2[%c0_41, %c0_42] : memref<1x1xf32, #tpu.memory_space<smem>>
      %125 = arith.cmpf oge, %108, %89 : vector<8x1xf32>
      %cst_43 = arith.constant 1.000000e+00 : f32
      %cst_44 = arith.constant 0.000000e+00 : f32
      %126 = vector.broadcast %cst_43 : f32 to vector<8x1xf32>
      %127 = vector.broadcast %cst_44 : f32 to vector<8x1xf32>
      %128 = arith.select %125, %126, %127 : vector<8x1xi1>, vector<8x1xf32>
      %129 = arith.mulf %128, %72 : vector<8x1xf32>
      %130 = vector.shape_cast %129 : vector<8x1xf32> to vector<1x8x1xf32>
      %cst_45 = arith.constant dense<0.000000e+00> : vector<1xf32>
      %131 = vector.multi_reduction <add>, %130, %cst_45 [1, 2] : vector<1x8x1xf32> to vector<1xf32>
      %132 = vector.shape_cast %131 : vector<1xf32> to vector<1x1x1xf32>
      %133 = vector.extract %132[0, 0, 0] : f32 from vector<1x1x1xf32>
      %134 = arith.fptosi %133 : f32 to i32
      %c0_46 = arith.constant 0 : index
      %c0_47 = arith.constant 0 : index
      %135 = memref.load %arg3[%c0_46, %c0_47] : memref<1x1xi32, #tpu.memory_space<smem>>
      memref.store %134, %arg3[%c0_46, %c0_47] : memref<1x1xi32, #tpu.memory_space<smem>>
    } else {
    }
    return
  }
  func.func @transform_0(%arg0: i32) -> (i32, i32) {
    %c0_i32 = arith.constant 0 : i32
    %c0_i32_0 = arith.constant 0 : i32
    return %arg0, %c0_i32 : i32, i32
  }
  func.func @transform_1(%arg0: i32) -> (i32, i32) {
    %c0_i32 = arith.constant 0 : i32
    %c0_i32_0 = arith.constant 0 : i32
    %c0_i32_1 = arith.constant 0 : i32
    return %c0_i32, %c0_i32_0 : i32, i32
  }
  func.func @transform_2(%arg0: i32) -> (i32, i32) {
    %c0_i32 = arith.constant 0 : i32
    %c0_i32_0 = arith.constant 0 : i32
    %c0_i32_1 = arith.constant 0 : i32
    return %c0_i32, %c0_i32_0 : i32, i32
  }
}

</mosaic_0001>

<bundles_post_ra>
// kernel: tpu_custom_call.1
= control target key start
LH: loop header
LB: loop body
LE: loop exit
PB: predicated region body
PF: predicated region fallthrough
CT: control target
= control target key end

     0   :  { %8 = vsyncpa [#allocation4], 0  ;;  %s645_s0 = inlined_call_operand.hbm [shape: f32[24,32], index: 0, kind: input, shape index: {}]   ;;  %s646_s1 = inlined_call_operand.hbm [shape: f32[1,1], index: 1, kind: output, shape index: {0}]   ;;  %s647_s2 = inlined_call_operand.hbm [shape: s32[1,1], index: 2, kind: output, shape index: {1}]  }
   0x1   :  { %9 = vsyncpa [#allocation5], 0 }
   0x2   :  { %10 = vsyncpa [#allocation8], 0  ;;  %s545_s9 = smov [#allocation3]   ;;  %s497_s13 = scalar_lea.hbm %s645_s0, 384 }
   0x3   :  { %s16_s10 = sshll.u32 %s545_s9, 4  ;;  %p498_p0 = scmp.ne.s32.totalorder %s645_s0, %s497_s13  ;;  %s17_s10 = int_to_ptr.vmem [resolvable:$true] %s16_s10 }
   0x4   :  { %p501_p1 = scmp.lt.u32.totalorder %s497_s13, %s645_s0 }
   0x6   :  { %p503_p2 = pnand %p501_p1, %p498_p0 }
   0x8   :  { %506 = shalt.err (!%p503_p2)
}
   0x9   :  { %s507_s18 = scalar_lea.vmem %s17_s10, 384  ;;  %p512_p4 = scmp.lt.s32.totalorder %s17_s10, %s17_s10 }
   0xa   :  { %p508_p3 = scmp.ne.s32.totalorder %s17_s10, %s507_s18  ;;  %p513_p5 = scmp.lt.s32.totalorder %s507_s18, %s507_s18 }
   0xc   :  { %p514_p6 = por %p513_p5, %p512_p4 }
   0xe   :  { %p515_p7 = pnand %p514_p6, %p508_p3 }
  0x10   :  { %518 = shalt.err (!%p515_p7)
}
  0x11   :  { %s546_s19 = smov 128   ;;  %s547_s20 = smov 8  }
  0x12   :  { %22 = dma.hbm_to_vmem [thread:$0]  %s645_s0, 384, %s17_s10, [#allocation4], %s546_s19, %s546_s19, %s547_s20  }
  0x13   :  { %539 = dma.done.wait [#allocation4], 384  }
  0x14   :  { %540 = vsyncadd [#allocation4], 4294966912  ;;  %v36_v0 = vlaneseq  ;;  %v548_v1 = vmov 0.0|0.0   ;;  %vm549_vm0 = vmmov 0   ;;  %v550_v2 = vmov 0.0   ;;  %v32_v7 = vld [vmem:[#allocation3] sm:$0xff] }
  0x15   :  { %461 = vmatprep.subr.bf16.mxu0 %v548_v1  ;;  %448 = vmatprep.mubr.msk.f32.mxu0 %vm549_vm0, %v550_v2  ;;  %vm30_vm1 = vcmask 261120   ;;  %v33_v8 = vld [vmem:[#allocation3 + $0x8] sm:$0xff]  ;;  %v34_v10 = vld [vmem:[#allocation3 + $0x10] sm:$0xff]  ;;  %vm50_vm5 = vcmask 195584   ;;  %v551_v20 = vmov 1.0   ;;  %vm552_vm14 = vmmov 1  }
  0x16   :  { %v584_v3 = vshrl.u32 %v36_v0, 7  ;;  %v39_v4 = vand.u32 127, %v36_v0  ;;  %31 = vst.msk [vmem:[#allocation2] sm:$0xff] %vm30_vm1, %v550_v2  ;;  %451 = vmatprep.subr.mxu1 %v550_v2  ;;  %453 = vmatprep.mubr.msk.f32.mxu1 %vm549_vm0, %v550_v2  ;;  %v462_v9 = vpack.c.bf16 %v33_v8, %v32_v7  ;;  %s519_s29 = scalar_lea.hbm %s646_s1, 16 }
  0x17   :  { %p520_p9 = scmp.ne.s32.totalorder %s646_s1, %s519_s29  ;;  %p523_p10 = scmp.lt.u32.totalorder %s519_s29, %s646_s1 }
  0x18   :  { %v42_v5 = vmul.u32 4, %v584_v3  ;;  %463 = vmatpush3.bf16.msra.mxu0 %v462_v9  ;;  %v296_v21 = vsub.s32 %v584_v3, %v39_v4  ;;  %vm305_vm10 = vcmp.lt.s32.totalorder %v584_v3, 6  ;;  %vm306_vm11 = vcmp.lt.s32.totalorder %v39_v4, 6 }
  0x19   :  { %446 = vmatprep.subr.mxu0 %v550_v2  ;;  %vm307_vm13 = vmand %vm305_vm10, %vm306_vm11  ;;  %v433_v9 = vsel %vm305_vm10, 1.0, %v550_v2  ;;  %p525_p11 = pnand %p523_p10, %p520_p9 }
  0x1a   :  { %vm43_vm2 = vcmp.ge.s32.totalorder %v39_v4, %v42_v5  ;;  %v44_v6 = vadd.s32 4, %v42_v5  ;;  %v298_v23 = vsub.s32 0, %v296_v21 }
  0x1c   :  { %vm45_vm3 = vcmp.lt.s32.totalorder %v39_v4, %v44_v6  ;;  %447 = vmatpush3.msra.mxu0 %v34_v10  ;;  %v432_v27 = vmin.u32 %v298_v23, %v296_v21 }
  0x1d   :  { %vm46_vm4 = vmand %vm43_vm2, %vm45_vm3  ;;  %v47_v12 = vld [vmem:[#allocation2] sm:$0xff] }
  0x1e   :  { %v426_v11 = vsel %vm46_vm4, 1.0, %v550_v2  ;;  %vm300_vm6 = vcmp.eq.s32.totalorder %v432_v27, 0  ;;  %vm301_vm7 = vcmp.eq.s32.totalorder %v432_v27, 2  ;;  %vm303_vm9 = vcmp.eq.s32.totalorder %v432_v27, 4 }
  0x1f   :  { %449 = vmatmul.mubr.msk.f32.vlgmr.msra.gmra.mrb[0].mxu0 %vm50_vm5, %v426_v11  ;;  %vm302_vm8 = vmor %vm300_vm6, %vm301_vm7  ;;  %vm317_vm4 = vcmask 64512   ;;  %vm370_vm6 = vcmask 7168  }
  0x20   :  { %vm304_vm12 = vmor %vm302_vm8, %vm303_vm9 }
  0x21   :  { %vm310_vm15 = vmxor %vm304_vm12, %vm552_vm14 }
  0xf2   :  { %v120_v13 = vpop.f32.mrb[0].mxu0 }
  0xf3   :  { %v124_v14 = vadd.f32 %v120_v13, %v47_v12  ;;  %v450_v15 = vpop.f32.mrb[1].mxu0 }
  0xf5   :  { %126 = vst.msk [vmem:[#allocation2] sm:$0xff] %vm30_vm1, %v124_v14 }
  0xfc   :  { %v130_v16 = vld [vmem:[#allocation2] sm:$0xff] }
  0xfd   :  { %v131_v17 = vmul.f32 0.25, %v130_v16 }
  0xff   :  { %452 = vmatpush3.xpose.msk.msra.mxu1 %vm30_vm1, %v131_v17  ;;  %v132_v18 = vmul.f32 %v131_v17, %v131_v17 }
 0x100   :  { %456 = vmatprep.subr.mxu1 %v550_v2 }
 0x101   :  { %v133_v19 = vsel %vm30_vm1, %v132_v18, 0.0 }
 0x102   :  { %454 = vmatmul.mubr.msk.f32.vlgmr.msra.gmra.mrb[0].mxu1 %vm30_vm1, %v131_v17  ;;  %134 = vadd.xlane.f32.xlu0 %v133_v19 }
 0x103   :  { %457 = vmatpush3.xpose.msk.msra.mxu1 %vm30_vm1, %v132_v18  ;;  %458 = vmatprep.mubr.msk.f32.mxu1 %vm549_vm0, %v550_v2  ;;  %vm308_vm0 = vmand %vm304_vm12, %vm307_vm13 }
 0x104   :  { %v309_v36 = vsel %vm308_vm0, 1.0, %v550_v2 }
 0x106   :  { %459 = vmatmul.mubr.msk.f32.vlgmr.msra.gmra.mrb[2].mxu1 %vm30_vm1, %v551_v20  ;;  %vm311_vm1 = vmand %vm310_vm15, %vm307_vm13 }
 0x107   :  { %v312_v37 = vsel %vm311_vm1, 1.0, %v550_v2 }
 0x18f   :  { %v135_v25 = vpop.xlane.xlu0 %134 }
 0x1d5   :  { %v205_v22 = vpop.f32.mrb[0].mxu1 }
 0x1d6   :  { %v455_v24 = vpop.f32.mrb[1].mxu1  ;;  %v286_v28 = vmul.f32 2.0, %v205_v22 }
 0x1d9   :  { %v281_v26 = vpop.f32.mrb[2].mxu1 }
 0x1da   :  { %v285_v29 = vadd.f32 %v281_v26, %v135_v25  ;;  %v460_v30 = vpop.f32.mrb[3].mxu1 }
 0x1dc   :  { %v287_v31 = vsub.f32 %v285_v29, %v286_v28 }
 0x1de   :  { %v288_v32 = vmax.f32 %v287_v31, 1e-12 }
 0x1e0   :  { %483 = vrsqrt.f32 %v288_v32  ;;  %vm291_vm2 = vcmp.eq.f32.partialorder %v288_v32, inf  ;;  %v294_v35 = vand.u32 2147483648, %v288_v32  ;;  %vm293_vm3 = vcmp.eq.f32.partialorder %v288_v32, 0.0 }
 0x1ea   :  { %v484_v33 = vpop.eup %483 }
 0x1eb   :  { %v290_v34 = vmul.f32 %v484_v33, %v288_v32 }
 0x1ed   :  { %v292_v38 = vsel %vm291_vm2, %v288_v32, %v290_v34 }
 0x1ee   :  { %v295_v39 = vsel %vm293_vm3, %v294_v35, %v292_v38 }
 0x1ef   :  { %v315_v40 = vmul.f32 %v309_v36, %v295_v39  ;;  %v316_v41 = vmul.f32 %v312_v37, %v295_v39 }
 0x1f1   :  { %v318_v42 = vsel %vm317_vm4, %v315_v40, -inf  ;;  %v335_v43 = vsub.f32 0.0, %v316_v41 }
 0x1f2   :  { %319 = vmax.xlane.f32.xlu0 %v318_v42 }
 0x1f3   :  { %v336_v44 = vsel %vm317_vm4, %v335_v43, -inf }
 0x1f4   :  { %337 = vmax.xlane.f32.xlu1 %v336_v44 }
 0x27f   :  { %v320_v45 = vpop.xlane.xlu0 %319 }
 0x280   :  { %v321_v46 = vsub.f32 %v315_v40, %v320_v45 }
 0x281   :  { %v338_v47 = vpop.xlane.xlu1 %337 }
 0x282   :  { %v322_v48 = vmul.f32 1.442695, %v321_v46  ;;  %v339_v49 = vsub.f32 %v335_v43, %v338_v47 }
 0x284   :  { %485 = vpow2.f32 %v322_v48  ;;  %v340_v50 = vmul.f32 1.442695, %v339_v49 }
 0x286   :  { %487 = vpow2.f32 %v340_v50 }
 0x28e   :  { %v486_v51 = vpop.eup %485 }
 0x28f   :  { %v324_v52 = vmul.f32 %v486_v51, %v309_v36 }
 0x290   :  { %v488_v53 = vpop.eup %487 }
 0x291   :  { %v329_v54 = vsel %vm317_vm4, %v324_v52, 0.0  ;;  %v342_v55 = vmul.f32 %v488_v53, %v312_v37  ;;  %v325_v56 = vmul.f32 %v324_v52, %v315_v40 }
 0x292   :  { %330 = vadd.xlane.f32.xlu1 %v329_v54 }
 0x293   :  { %v347_v57 = vsel %vm317_vm4, %v342_v55, 0.0  ;;  %v343_v58 = vmul.f32 %v342_v55, %v316_v41  ;;  %v326_v59 = vsel %vm317_vm4, %v325_v56, 0.0 }
 0x294   :  { %348 = vadd.xlane.f32.xlu0 %v347_v57 }
 0x295   :  { %v344_v60 = vsel %vm317_vm4, %v343_v58, 0.0 }
 0x296   :  { %327 = vadd.xlane.f32.xlu1 %v326_v59 }
 0x298   :  { %345 = vadd.xlane.f32.xlu0 %v344_v60 }
 0x31f   :  { %v331_v61 = vpop.xlane.xlu1 %330 }
 0x320   :  { %v332_v62 = vadd.f32 1e-06, %v331_v61 }
 0x321   :  { %v349_v63 = vpop.xlane.xlu0 %348 }
 0x322   :  { %489 = vrcp.f32 %v332_v62  ;;  %v350_v0 = vadd.f32 1e-06, %v349_v63 }
 0x323   :  { %v328_v5 = vpop.xlane.xlu1 %327 }
 0x324   :  { %491 = vrcp.f32 %v350_v0 }
 0x325   :  { %v346_v6 = vpop.xlane.xlu0 %345 }
 0x32c   :  { %v490_v1 = vpop.eup %489 }
 0x32d   :  { %v334_v7 = vmul.f32 %v490_v1, %v328_v5 }
 0x32e   :  { %v492_v4 = vpop.eup %491 }
 0x32f   :  { %v352_v8 = vmul.f32 %v492_v4, %v346_v6 }
 0x331   :  { %v353_v10 = vsub.f32 %v334_v7, %v352_v8  ;;  %vm384_vm5 = vcmp.ge.f32.partialorder %v352_v8, %v334_v7 }
 0x332   :  { %v385_v11 = vsel %vm384_vm5, 1.0, %v550_v2 }
 0x333   :  { %v355_v12 = vand.u32 2147483647, %v353_v10  ;;  %v386_v13 = vmul.f32 %v433_v9, %v385_v11  ;;  %v354_v24 = vmax.f32 %v353_v10, 0.0 }
 0x335   :  { %v356_v14 = vsub.f32 0.0, %v355_v12  ;;  %v387_v15 = vsel %vm370_vm6, %v386_v13, 0.0 }
 0x336   :  { %388 = vadd.xlane.f32.xlu0 %v387_v15 }
 0x337   :  { %v357_v16 = vmul.f32 1.442695, %v356_v14 }
 0x339   :  { %493 = vpow2.f32 %v357_v16 }
 0x343   :  { %v494_v17 = vpop.eup %493 }
 0x344   :  { %v359_v18 = vadd.f32 1.0, %v494_v17  ;;  %v362_v19 = vmul.f32 -0.5, %v494_v17  ;;  %v365_v3 = vand.u32 2147483647, %v494_v17 }
 0x346   :  { %495 = vlog2.f32 %v359_v18  ;;  %v363_v20 = vadd.f32 1.0, %v362_v19  ;;  %vm366_vm7 = vcmp.lt.f32.partialorder %v365_v3, 0.0004427343 }
 0x348   :  { %v364_v23 = vmul.f32 %v494_v17, %v363_v20 }
 0x350   :  { %v496_v21 = vpop.eup %495 }
 0x351   :  { %v361_v22 = vmul.f32 0.6931472, %v496_v21 }
 0x353   :  { %v367_v2 = vsel %vm366_vm7, %v364_v23, %v361_v22 }
 0x354   :  { %v368_v25 = vadd.f32 %v367_v2, %v354_v24 }
 0x356   :  { %v369_v26 = vmul.f32 %v433_v9, %v368_v25 }
 0x358   :  { %v371_v27 = vsel %vm370_vm6, %v369_v26, 0.0 }
 0x359   :  { %372 = vadd.xlane.f32.xlu1 %v371_v27 }
 0x3c3   :  { %v389_v28 = vpop.xlane.xlu0 %388 }
 0x3c4   :  { %v390_v29 = vrot.slane %v389_v28, 4 }
 0x3c6   :  { %v391_v30 = vadd.f32 %v390_v29, %v389_v28 }
 0x3c8   :  { %v392_v31 = vrot.slane %v391_v30, 2 }
 0x3ca   :  { %v393_v35 = vadd.f32 %v392_v31, %v391_v30 }
 0x3cc   :  { %v394_v38 = vrot.slane %v393_v35, 1 }
 0x3ce   :  { %v395_v41 = vadd.f32 %v394_v38, %v393_v35 }
 0x3e6   :  { %v373_v32 = vpop.xlane.xlu1 %372 }
 0x3e7   :  { %v374_v33 = vrot.slane %v373_v32, 4 }
 0x3e9   :  { %v375_v34 = vadd.f32 %v374_v33, %v373_v32 }
 0x3eb   :  { %v376_v36 = vrot.slane %v375_v34, 2 }
 0x3ed   :  { %v377_v37 = vadd.f32 %v376_v36, %v375_v34 }
 0x3ef   :  { %v378_v39 = vrot.slane %v377_v37, 1 }
 0x3f1   :  { %v379_v40 = vadd.f32 %v378_v39, %v377_v37 }
 0x3f3   :  { %464 = vpush %v379_v40 }
 0x3f4   :  { %466 = vpush %v395_v41 }
 0x424   :  { %s465_s0 = spop %464 }
 0x425   :  { %s381_s23 = smul.f32 0.16666667, %s465_s0  ;;  %s467_s24 = spop %466 }
 0x426   :  { %p468_p8 = scmp.lt.s32.totalorder %s467_s24, 0  ;;  %s469_s25 = sceil.f32 %s467_s24 }
 0x427   :  { %s470_s26 = sfloor.f32 %s467_s24  ;;  %383 = sst [smem:[#allocation6]] %s381_s23 }
 0x428   :  { %s649_s25 = smov (!%p468_p8, %s469_s25), %s470_s26 }
 0x429   :  { %528 = shalt.err (!%p525_p11)
}
 0x42a   :  { %s553_s6 = smov [#allocation6]   ;;  %s472_s9 = scvt.f32.s32 %s649_s25 }
 0x42b   :  { %407 = dma.smem_to_hbm %s553_s6, 16, %s646_s1, [#allocation5]  }
 0x42c   :  { %399 = sst [smem:[#allocation7]] %s472_s9  ;;  %s529_s12 = scalar_lea.hbm %s647_s2, 16 }
 0x42d   :  { %p530_p12 = scmp.ne.s32.totalorder %s647_s2, %s529_s12  ;;  %p533_p13 = scmp.lt.u32.totalorder %s529_s12, %s647_s2 }
 0x42f   :  { %p535_p0 = pnand %p533_p13, %p530_p12 }
 0x431   :  { %538 = shalt.err (!%p535_p0)
}
 0x432   :  { %s554_s17 = smov [#allocation7]  }
 0x433   :  { %415 = dma.smem_to_hbm %s554_s17, 16, %s647_s2, [#allocation8]  }
 0x434   :  { %541 = dma.done.wait [#allocation5], 16  }
 0x435   :  { %542 = vsyncadd [#allocation5], 4294967280 }
 0x436   :  { %543 = dma.done.wait [#allocation8], 16  }
 0x437   :  { %544 = vsyncadd [#allocation8], 4294967280 }
 0x438   :  { %422 = sfence }
 0x439   :  { %423 = vsyncpa [#allocation4], 1 }
 0x43a   :  { %424 = vsyncpa [#allocation5], 1 }
 0x43b   :  { %425 = vsyncpa [#allocation8], 1 }

</bundles_post_ra>
